<compile_context>
chip_gen: v6e
topology: v6e:2x2x1
jax: 0.10.0
libtpu: 0.0.40
codegen_flags: <defaults>
</compile_context>

<pallas_src>
import jax
import jax.numpy as jnp
from jax.experimental import pallas as pl
from jax.experimental.pallas import tpu as pltpu


def _round_up(x, m):
    return (x + m - 1) // m * m


def mlp_kernel(x_ref, w1_ref, b1_ref, w2_ref, b2_ref, w3_ref, b3_ref, o_ref):
    # In-kernel f32 -> bf16 cast of the activation tile (VPU has huge slack here).
    x = x_ref[...].astype(jnp.bfloat16)
    # Layer 1: bf16 matmul on the MXU, f32 accumulate; bias + ReLU on the VPU in f32.
    h1 = jnp.dot(x, w1_ref[...], preferred_element_type=jnp.float32)
    h1 = jnp.maximum(h1 + b1_ref[...], 0.0)
    # Layer 2: Linear + ReLU (re-cast activation to bf16 for the MXU).
    h2 = jnp.dot(h1.astype(jnp.bfloat16), w2_ref[...],
                 preferred_element_type=jnp.float32)
    h2 = jnp.maximum(h2 + b2_ref[...], 0.0)
    # Layer 3: Linear (logits, no activation).
    out = jnp.dot(h2.astype(jnp.bfloat16), w3_ref[...],
                  preferred_element_type=jnp.float32)
    o_ref[...] = (out + b3_ref[...]).astype(o_ref.dtype)


def prepare_params(w1, b1, w2, b2, w3, b3):
    """One-time preprocessing: pad feature dims to 128-multiples, cast weights to bf16.

    w*: [in_features, out_features] f32 (pre-transposed vs. PyTorch), b*: [out] f32.
    """
    in_f, hid = w1.shape
    ncls = w3.shape[1]
    in_p = _round_up(in_f, 128)
    hid_p = _round_up(hid, 128)
    cls_p = _round_up(ncls, 128)

    def padw(w, rows, cols):
        w = w.astype(jnp.bfloat16)
        return jnp.pad(w, ((0, rows - w.shape[0]), (0, cols - w.shape[1])))

    def padb(b, cols):
        b = b.astype(jnp.float32)
        return jnp.pad(b, (0, cols - b.shape[0])).reshape(1, cols)

    return {
        "w1": padw(w1, in_p, hid_p), "b1": padb(b1, hid_p),
        "w2": padw(w2, hid_p, hid_p), "b2": padb(b2, hid_p),
        "w3": padw(w3, hid_p, cls_p), "b3": padb(b3, cls_p),
        "dims": (in_f, hid, ncls),
    }


def neural_network_forward(x, params, *, block_batch=512):
    """Fused 3-layer MLP forward.

    x      : [batch, input_size] f32
    params : output of prepare_params (pre-padded bf16 weights, f32 biases)
    Returns [batch, num_classes] f32.
    """
    batch, in_f = x.shape
    w1p, b1p = params["w1"], params["b1"]
    w2p, b2p = params["w2"], params["b2"]
    w3p, b3p = params["w3"], params["b3"]
    in_f0, hid0, ncls = params["dims"]
    assert in_f == in_f0, (in_f, in_f0)
    in_p, hid_p = w1p.shape
    cls_p = w3p.shape[1]

    # ---- batch tile selection -------------------------------------------------
    # Balanced tiles (the last tile is never mostly padding), 16-row multiples so
    # bf16 activation vregs are unmasked (f32 I/O only needs 8, 16 satisfies both).
    block_batch = max(16, (block_batch // 16) * 16)
    nb_target = -(-batch // block_batch)                 # ceil div
    tb = _round_up(-(-batch // nb_target), 16)
    # Megacore: ensure the "parallel" batch axis has >=2 steps when the tile is
    # big enough to split (otherwise the second TensorCore on v7x idles).
    if nb_target == 1 and tb >= 32:
        tb = _round_up(tb // 2, 16)
    batch_p = _round_up(batch, tb)
    nb = batch_p // tb

    # x stays f32 (cast happens in-kernel); pad only when actually needed.
    if batch_p != batch or in_p != in_f:
        xp = jnp.pad(x, ((0, batch_p - batch), (0, in_p - in_f)))
    else:
        xp = x

    # ---- VMEM budget ------------------------------------------------------------
    x_tile_b = tb * in_p * 4 * 2                  # double-buffered f32 x tile
    o_tile_b = tb * cls_p * 4 * 2                 # double-buffered f32 out tile
    w_bytes = (w1p.size + w2p.size + w3p.size) * 2   # bf16 weights, Buffered(1)
    b_bytes = (b1p.size + b2p.size + b3p.size) * 4   # f32 biases, Buffered(1)
    act_bytes = tb * hid_p * 4 * 2 + tb * cls_p * 4  # f32 h1/h2/out intermediates
    vmem_need = x_tile_b + o_tile_b + w_bytes + b_bytes + act_bytes
    try:
        vmem_cap = int(pltpu.get_tpu_info().vmem_capacity_bytes)
    except Exception:
        vmem_cap = 64 * 1024 * 1024               # conservative (v7x) fallback
    # Leave ~16 MiB headroom below physical VMEM for compiler scratch / spills.
    vmem_limit = max(16 << 20,
                     min(int(vmem_need * 1.25) + (4 << 20), vmem_cap - (16 << 20)))

    flops = 2 * batch_p * (in_p * hid_p + hid_p * hid_p + hid_p * cls_p)
    bytes_accessed = (
        4 * xp.size                                   # f32 input (read once)
        + 2 * (w1p.size + w2p.size + w3p.size)        # bf16 weights (VMEM-resident)
        + 4 * (b1p.size + b2p.size + b3p.size)        # f32 biases
        + 4 * batch_p * cls_p                         # f32 output
    )

    def resident_spec(shape):
        # Constant index_map -> same block every grid step; single-buffered.
        return pl.BlockSpec(shape, lambda i: (0, 0), pipeline_mode=pl.Buffered(1))

    out_padded = pl.pallas_call(
        mlp_kernel,
        out_shape=jax.ShapeDtypeStruct((batch_p, cls_p), jnp.float32),
        grid=(nb,),
        in_specs=[
            # x: one batch tile per grid step (double-buffered by default).
            pl.BlockSpec((tb, in_p), lambda i: (i, 0)),
            # Weights / biases: VMEM-resident across steps, single-buffered.
            resident_spec((in_p, hid_p)),
            resident_spec((1, hid_p)),
            resident_spec((hid_p, hid_p)),
            resident_spec((1, hid_p)),
            resident_spec((hid_p, cls_p)),
            resident_spec((1, cls_p)),
        ],
        out_specs=pl.BlockSpec((tb, cls_p), lambda i: (i, 0)),
        compiler_params=pltpu.CompilerParams(
            dimension_semantics=("parallel",),   # shard batch tiles on v7x's 2 TCs
            vmem_limit_bytes=vmem_limit,
        ),
        cost_estimate=pl.CostEstimate(
            flops=flops, transcendentals=0, bytes_accessed=bytes_accessed),
    )(xp, w1p, b1p, w2p, b2p, w3p, b3p)

    # Skip the slice (an extra HBM round trip) when no padding was applied.
    if batch_p == batch and cls_p == ncls:
        return out_padded
    return out_padded[:batch, :ncls]


def init_params(key, input_size, hidden_size, num_classes):
    # Deterministic synthetic init (PyTorch-Linear-style uniform bounds),
    # stored pre-transposed as [in, out]; biases as [out].
    ks = jax.random.split(key, 6)

    def lin(kw, kb, fan_in, fan_out):
        bound = 1.0 / jnp.sqrt(fan_in)
        w = jax.random.uniform(kw, (fan_in, fan_out), jnp.float32, -bound, bound)
        b = jax.random.uniform(kb, (fan_out,), jnp.float32, -bound, bound)
        return w, b

    w1, b1 = lin(ks[0], ks[1], input_size, hidden_size)
    w2, b2 = lin(ks[2], ks[3], hidden_size, hidden_size)
    w3, b3 = lin(ks[4], ks[5], hidden_size, num_classes)
    return w1, b1, w2, b2, w3, b3


if __name__ == "__main__":
    key = jax.random.PRNGKey(0)
    k_x, k_p = jax.random.split(key)

    batch, input_size, hidden_size, num_classes = 8, 16, 32, 10

    x = jax.random.normal(k_x, (batch, input_size), dtype=jnp.float32)
    w1, b1, w2, b2, w3, b3 = init_params(k_p, input_size, hidden_size, num_classes)

    # One-time weight preprocessing (pad to 128-multiples, cast to bf16).
    params = prepare_params(w1, b1, w2, b2, w3, b3)

    out = neural_network_forward(x, params)
    out = jax.block_until_ready(out)

    # Reference check against plain f32 JAX (same math as the PyTorch forward).
    # Tolerance loosened because the kernel uses bf16 operands (f32 accumulate).
    h = jnp.maximum(x @ w1 + b1[None, :], 0.0)
    h = jnp.maximum(h @ w2 + b2[None, :], 0.0)
    ref = h @ w3 + b3[None, :]

    assert out.shape == (batch, num_classes)
    assert jnp.allclose(out, ref, atol=5e-2, rtol=5e-2), (
        f"max abs err {jnp.max(jnp.abs(out - ref))}")

    print("KERNEL_OK")
</pallas_src>

<mosaic_0001>
module attributes {stable_mosaic.version = 11 : i64} {
  func.func @mlp_kernel(%arg0: i32, %arg1: memref<16x128xf32, #tpu.memory_space<vmem>>, %arg2: memref<128x128xbf16, #tpu.memory_space<vmem>>, %arg3: memref<1x128xf32, #tpu.memory_space<vmem>>, %arg4: memref<128x128xbf16, #tpu.memory_space<vmem>>, %arg5: memref<1x128xf32, #tpu.memory_space<vmem>>, %arg6: memref<128x128xbf16, #tpu.memory_space<vmem>>, %arg7: memref<1x128xf32, #tpu.memory_space<vmem>>, %arg8: memref<16x128xf32, #tpu.memory_space<vmem>>) attributes {dimension_semantics = [#tpu.dimension_semantics<parallel>], iteration_bounds = array<i64: 1>, scalar_prefetch = 0 : i64, scratch_operands = 0 : i64, tpu.core_type = #tpu.core_type<tc>, window_params = [{transform_indices = @transform_0, window_bounds = array<i64: 16, 128>}, {pipeline_mode = #tpu.pipeline_mode<synchronous>, transform_indices = @transform_1, window_bounds = array<i64: 128, 128>}, {pipeline_mode = #tpu.pipeline_mode<synchronous>, transform_indices = @transform_2, window_bounds = array<i64: 1, 128>}, {pipeline_mode = #tpu.pipeline_mode<synchronous>, transform_indices = @transform_3, window_bounds = array<i64: 128, 128>}, {pipeline_mode = #tpu.pipeline_mode<synchronous>, transform_indices = @transform_4, window_bounds = array<i64: 1, 128>}, {pipeline_mode = #tpu.pipeline_mode<synchronous>, transform_indices = @transform_5, window_bounds = array<i64: 128, 128>}, {pipeline_mode = #tpu.pipeline_mode<synchronous>, transform_indices = @transform_6, window_bounds = array<i64: 1, 128>}, {transform_indices = @transform_7, window_bounds = array<i64: 16, 128>}]} {
    %c0 = arith.constant 0 : index
    %c0_0 = arith.constant 0 : index
    %0 = vector.load %arg1[%c0, %c0_0] : memref<16x128xf32, #tpu.memory_space<vmem>>, vector<16x128xf32>
    %1 = arith.truncf %0 : vector<16x128xf32> to vector<16x128xbf16>
    %c0_1 = arith.constant 0 : index
    %c0_2 = arith.constant 0 : index
    %2 = vector.load %arg2[%c0_1, %c0_2] : memref<128x128xbf16, #tpu.memory_space<vmem>>, vector<128x128xbf16>
    %cst = arith.constant dense<0.000000e+00> : vector<16x128xf32>
    %3 = tpu.matmul %1, %2, %cst {dimension_numbers = #tpu.dot_dimension_numbers<[1], [0], [0], [1], [0, 0, 1, 1], [], []>} : vector<16x128xbf16>, vector<128x128xbf16>, vector<16x128xf32> -> vector<16x128xf32>
    %c0_3 = arith.constant 0 : index
    %c0_4 = arith.constant 0 : index
    %4 = vector.load %arg3[%c0_3, %c0_4] : memref<1x128xf32, #tpu.memory_space<vmem>>, vector<1x128xf32>
    %5 = vector.broadcast %4 : vector<1x128xf32> to vector<16x128xf32>
    %6 = arith.addf %3, %5 : vector<16x128xf32>
    %cst_5 = arith.constant 0.000000e+00 : f32
    %7 = vector.broadcast %cst_5 : f32 to vector<16x128xf32>
    %8 = arith.maximumf %6, %7 : vector<16x128xf32>
    %9 = arith.truncf %8 : vector<16x128xf32> to vector<16x128xbf16>
    %c0_6 = arith.constant 0 : index
    %c0_7 = arith.constant 0 : index
    %10 = vector.load %arg4[%c0_6, %c0_7] : memref<128x128xbf16, #tpu.memory_space<vmem>>, vector<128x128xbf16>
    %cst_8 = arith.constant dense<0.000000e+00> : vector<16x128xf32>
    %11 = tpu.matmul %9, %10, %cst_8 {dimension_numbers = #tpu.dot_dimension_numbers<[1], [0], [0], [1], [0, 0, 1, 1], [], []>} : vector<16x128xbf16>, vector<128x128xbf16>, vector<16x128xf32> -> vector<16x128xf32>
    %c0_9 = arith.constant 0 : index
    %c0_10 = arith.constant 0 : index
    %12 = vector.load %arg5[%c0_9, %c0_10] : memref<1x128xf32, #tpu.memory_space<vmem>>, vector<1x128xf32>
    %13 = vector.broadcast %12 : vector<1x128xf32> to vector<16x128xf32>
    %14 = arith.addf %11, %13 : vector<16x128xf32>
    %cst_11 = arith.constant 0.000000e+00 : f32
    %15 = vector.broadcast %cst_11 : f32 to vector<16x128xf32>
    %16 = arith.maximumf %14, %15 : vector<16x128xf32>
    %17 = arith.truncf %16 : vector<16x128xf32> to vector<16x128xbf16>
    %c0_12 = arith.constant 0 : index
    %c0_13 = arith.constant 0 : index
    %18 = vector.load %arg6[%c0_12, %c0_13] : memref<128x128xbf16, #tpu.memory_space<vmem>>, vector<128x128xbf16>
    %cst_14 = arith.constant dense<0.000000e+00> : vector<16x128xf32>
    %19 = tpu.matmul %17, %18, %cst_14 {dimension_numbers = #tpu.dot_dimension_numbers<[1], [0], [0], [1], [0, 0, 1, 1], [], []>} : vector<16x128xbf16>, vector<128x128xbf16>, vector<16x128xf32> -> vector<16x128xf32>
    %c0_15 = arith.constant 0 : index
    %c0_16 = arith.constant 0 : index
    %20 = vector.load %arg7[%c0_15, %c0_16] : memref<1x128xf32, #tpu.memory_space<vmem>>, vector<1x128xf32>
    %21 = vector.broadcast %20 : vector<1x128xf32> to vector<16x128xf32>
    %22 = arith.addf %19, %21 : vector<16x128xf32>
    %c0_17 = arith.constant 0 : index
    %c0_18 = arith.constant 0 : index
    %23 = vector.load %arg8[%c0_17, %c0_18] : memref<16x128xf32, #tpu.memory_space<vmem>>, vector<16x128xf32>
    tpu.vector_store %arg8[%c0_17, %c0_18], %22 {strides = array<i32>} : memref<16x128xf32, #tpu.memory_space<vmem>>, vector<16x128xf32>,
    return
  }
  func.func @transform_0(%arg0: i32) -> (i32, i32) {
    %c0_i32 = arith.constant 0 : i32
    %c0_i32_0 = arith.constant 0 : i32
    return %arg0, %c0_i32 : i32, i32
  }
  func.func @transform_1(%arg0: i32) -> (i32, i32) {
    %c0_i32 = arith.constant 0 : i32
    %c0_i32_0 = arith.constant 0 : i32
    %c0_i32_1 = arith.constant 0 : i32
    return %c0_i32, %c0_i32_0 : i32, i32
  }
  func.func @transform_2(%arg0: i32) -> (i32, i32) {
    %c0_i32 = arith.constant 0 : i32
    %c0_i32_0 = arith.constant 0 : i32
    %c0_i32_1 = arith.constant 0 : i32
    return %c0_i32, %c0_i32_0 : i32, i32
  }
  func.func @transform_3(%arg0: i32) -> (i32, i32) {
    %c0_i32 = arith.constant 0 : i32
    %c0_i32_0 = arith.constant 0 : i32
    %c0_i32_1 = arith.constant 0 : i32
    return %c0_i32, %c0_i32_0 : i32, i32
  }
  func.func @transform_4(%arg0: i32) -> (i32, i32) {
    %c0_i32 = arith.constant 0 : i32
    %c0_i32_0 = arith.constant 0 : i32
    %c0_i32_1 = arith.constant 0 : i32
    return %c0_i32, %c0_i32_0 : i32, i32
  }
  func.func @transform_5(%arg0: i32) -> (i32, i32) {
    %c0_i32 = arith.constant 0 : i32
    %c0_i32_0 = arith.constant 0 : i32
    %c0_i32_1 = arith.constant 0 : i32
    return %c0_i32, %c0_i32_0 : i32, i32
  }
  func.func @transform_6(%arg0: i32) -> (i32, i32) {
    %c0_i32 = arith.constant 0 : i32
    %c0_i32_0 = arith.constant 0 : i32
    %c0_i32_1 = arith.constant 0 : i32
    return %c0_i32, %c0_i32_0 : i32, i32
  }
  func.func @transform_7(%arg0: i32) -> (i32, i32) {
    %c0_i32 = arith.constant 0 : i32
    %c0_i32_0 = arith.constant 0 : i32
    return %arg0, %c0_i32 : i32, i32
  }
}

</mosaic_0001>

<bundles_post_ra>
// kernel: tpu_custom_call.1
= control target key start
LH: loop header
LB: loop body
LE: loop exit
PB: predicated region body
PF: predicated region fallthrough
CT: control target
= control target key end

     0   :  { %12 = vsyncpa [#allocation3], 0  ;;  %s826_s0 = inlined_call_operand.hbm [shape: f32[16,128], index: 0, kind: input, shape index: {}]   ;;  %s827_s1 = inlined_call_operand.hbm [shape: bf16[128,128], index: 1, kind: input, shape index: {}]   ;;  %s828_s2 = inlined_call_operand.vmem [shape: f32[1,128], index: 2, kind: input, shape index: {}]   ;;  %s829_s3 = inlined_call_operand.hbm [shape: bf16[128,128], index: 3, kind: input, shape index: {}]   ;;  %s830_s4 = inlined_call_operand.vmem [shape: f32[1,128], index: 4, kind: input, shape index: {}]   ;;  %s831_s5 = inlined_call_operand.hbm [shape: bf16[128,128], index: 5, kind: input, shape index: {}]   ;;  %s832_s6 = inlined_call_operand.vmem [shape: f32[1,128], index: 6, kind: input, shape index: {}]   ;;  %s833_s7 = inlined_call_operand.hbm [shape: f32[16,128], index: 7, kind: output, shape index: {}]  }
   0x1   :  { %13 = vsyncpa [#allocation6], 0 }
   0x2   :  { %14 = vsyncpa [#allocation9], 0 }
   0x3   :  { %15 = vsyncpa [#allocation4], 0  ;;  %s706_s24 = smov [#allocation5]  }
   0x4   :  { %s33_s25 = sshll.u32 %s706_s24, 4  ;;  %s34_s25 = int_to_ptr.vmem [resolvable:$true] %s33_s25 }
   0x5   :  { %s606_s26 = scalar_lea.vmem %s34_s25, 1024  ;;  %p611_p1 = scmp.lt.s32.totalorder %s34_s25, %s34_s25 }
   0x6   :  { %p607_p0 = scmp.ne.s32.totalorder %s34_s25, %s606_s26  ;;  %p612_p2 = scmp.lt.s32.totalorder %s606_s26, %s606_s26 }
   0x8   :  { %p613_p3 = por %p612_p2, %p611_p1 }
   0xa   :  { %p614_p4 = pnand %p613_p3, %p607_p0 }
   0xc   :  { %617 = shalt.err (!%p614_p4)
}
   0xd   :  { %s707_s27 = smov 64   ;;  %s708_s28 = smov 4  }
   0xe   :  { %39 = dma.hbm_to_vmem [thread:$0]  %s827_s1, 1024, %s34_s25, [#allocation6], %s707_s27, %s707_s27, %s708_s28  }
   0xf   :  { %s709_s8 = smov [#allocation2]  }
  0x10   :  { %s21_s9 = sshll.u32 %s709_s8, 4  ;;  %s22_s9 = int_to_ptr.vmem [resolvable:$true] %s21_s9 }
  0x11   :  { %s626_s10 = scalar_lea.vmem %s22_s9, 256  ;;  %p631_p6 = scmp.lt.s32.totalorder %s22_s9, %s22_s9 }
  0x12   :  { %p627_p5 = scmp.ne.s32.totalorder %s22_s9, %s626_s10  ;;  %p632_p7 = scmp.lt.s32.totalorder %s626_s10, %s626_s10 }
  0x14   :  { %p633_p8 = por %p632_p7, %p631_p6 }
  0x16   :  { %p634_p9 = pnand %p633_p8, %p627_p5 }
  0x18   :  { %637 = shalt.err (!%p634_p9)
}
  0x19   :  { %s710_s11 = smov 128   ;;  %s711_s12 = smov 8  }
  0x1a   :  { %27 = dma.hbm_to_vmem [thread:$0]  %s826_s0, 256, %s22_s9, [#allocation3], %s710_s11, %s710_s11, %s711_s12  }
  0x1b   :  { %s712_s1 = smov [#allocation7]   ;;  %s713_s16 = smov [#allocation8]  }
  0x1c   :  { %s47_s15 = sshll.u32 %s712_s1, 4  ;;  %s61_s17 = sshll.u32 %s713_s16, 4  ;;  %s48_s15 = int_to_ptr.vmem [resolvable:$true] %s47_s15  ;;  %s62_s17 = int_to_ptr.vmem [resolvable:$true] %s61_s17 }
  0x1d   :  { %s646_s18 = scalar_lea.vmem %s48_s15, 1024  ;;  %p651_p11 = scmp.lt.s32.totalorder %s48_s15, %s48_s15 }
  0x1e   :  { %p647_p10 = scmp.ne.s32.totalorder %s48_s15, %s646_s18  ;;  %p652_p12 = scmp.lt.s32.totalorder %s646_s18, %s646_s18 }
  0x20   :  { %p653_p13 = por %p652_p12, %p651_p11 }
  0x22   :  { %p654_p0 = pnand %p653_p13, %p647_p10 }
  0x24   :  { %657 = shalt.err (!%p654_p0)
}
  0x25   :  { %53 = dma.hbm_to_vmem [thread:$0]  %s829_s3, 1024, %s48_s15, [#allocation6], %s707_s27, %s707_s27, %s708_s28  }
  0x26   :  { %s666_s0 = scalar_lea.vmem %s62_s17, 1024  ;;  %p671_p2 = scmp.lt.s32.totalorder %s62_s17, %s62_s17 }
  0x27   :  { %p667_p1 = scmp.ne.s32.totalorder %s62_s17, %s666_s0  ;;  %p672_p3 = scmp.lt.s32.totalorder %s666_s0, %s666_s0 }
  0x29   :  { %p673_p4 = por %p672_p3, %p671_p2 }
  0x2b   :  { %p674_p5 = pnand %p673_p4, %p667_p1 }
  0x2d   :  { %677 = shalt.err (!%p674_p5)
}
  0x2e   :  { %67 = dma.hbm_to_vmem [thread:$0]  %s831_s5, 1024, %s62_s17, [#allocation9], %s707_s27, %s707_s27, %s708_s28  }
  0x2f   :  { %698 = dma.done.wait [#allocation3], 256  }
  0x30   :  { %699 = vsyncadd [#allocation3], 4294967040 }
  0x31   :  { %700 = dma.done.wait [#allocation6], 2048  }
  0x32   :  { %701 = vsyncadd [#allocation6], 4294965248 }
  0x33   :  { %702 = dma.done.wait [#allocation9], 1024  }
  0x34   :  { %703 = vsyncadd [#allocation9], 4294966272  ;;  %v714_v0 = vmov 0.0   ;;  %vm715_vm0 = vmmov 0   ;;  %v574_v1 = vld [vmem:[#allocation5 + $0x38] sm:$0xff]   ;;  %v575_v2 = vld [vmem:[#allocation5 + $0x30] sm:$0xff]  }
  0x35   :  { %503 = vmatprep.subr.bf16.mxu0 %v714_v0  ;;  %519 = vmatprep.mubr.msk.bf16.mxu0 %vm715_vm0, %v714_v0  ;;  %v576_v3 = vld [vmem:[#allocation5 + $0x28] sm:$0xff]   ;;  %v582_v4 = vld [vmem:[#allocation7 + $0x38] sm:$0xff]   ;;  %v577_v5 = vld [vmem:[#allocation5 + $0x20] sm:$0xff]   ;;  %s716_s26 = smov [#allocation10]  }
  0x36   :  { %523 = vmatprep.subr.bf16.mxu1 %v714_v0  ;;  %539 = vmatprep.mubr.msk.bf16.mxu1 %vm715_vm0, %v714_v0  ;;  %v583_v6 = vld [vmem:[#allocation7 + $0x30] sm:$0xff]   ;;  %v578_v7 = vld [vmem:[#allocation5 + $0x18] sm:$0xff]   ;;  %v584_v8 = vld [vmem:[#allocation7 + $0x28] sm:$0xff]   ;;  %s435_s27 = sshll.u32 %s716_s26, 4  ;;  %s436_s27 = int_to_ptr.vmem [resolvable:$true] %s435_s27 }
  0x37   :  { %504 = vmatpush3.bf16.msra.mxu0 %v574_v1  ;;  %524 = vmatpush3.bf16.msra.mxu1 %v582_v4  ;;  %v579_v9 = vld [vmem:[#allocation5 + $0x10] sm:$0xff]   ;;  %v585_v10 = vld [vmem:[#allocation7 + $0x20] sm:$0xff]   ;;  %v580_v11 = vld [vmem:[#allocation5 + $0x8] sm:$0xff]   ;;  %p683_p7 = scmp.lt.s32.totalorder %s436_s27, %s436_s27 }
  0x38   :  { %505 = vmatprep.subr.bf16.mxu0 %v714_v0  ;;  %525 = vmatprep.subr.bf16.mxu1 %v714_v0  ;;  %v586_v12 = vld [vmem:[#allocation7 + $0x18] sm:$0xff]   ;;  %v581_v13 = vld [vmem:[#allocation5] sm:$0xff]   ;;  %v83_v14 = vld [vmem:[#allocation2] sm:$0xff] }
  0x39   :  { %v84_v15 = vld [vmem:[#allocation2 + $0x8] sm:$0xff]  ;;  %v587_v17 = vld [vmem:[#allocation7 + $0x10] sm:$0xff]   ;;  %v588_v18 = vld [vmem:[#allocation7 + $0x8] sm:$0xff]  }
  0x3a   :  { %v85_v16 = vpack.c.bf16 %v84_v15, %v83_v14  ;;  %v589_v19 = vld [vmem:[#allocation7] sm:$0xff]   ;;  %v590_v20 = vld [vmem:[#allocation8 + $0x38] sm:$0xff]   ;;  %v591_v21 = vld [vmem:[#allocation8 + $0x30] sm:$0xff]  }
  0x3b   :  { %506 = vmatpush3.bf16.msra.mxu0 %v575_v2  ;;  %526 = vmatpush3.bf16.msra.mxu1 %v583_v6  ;;  %v592_v22 = vld [vmem:[#allocation8 + $0x28] sm:$0xff]   ;;  %v593_v23 = vld [vmem:[#allocation8 + $0x20] sm:$0xff]   ;;  %v594_v24 = vld [vmem:[#allocation8 + $0x18] sm:$0xff]  }
  0x3c   :  { %507 = vmatprep.subr.bf16.mxu0 %v714_v0  ;;  %527 = vmatprep.subr.bf16.mxu1 %v714_v0  ;;  %v449_v25 = vld [vmem:[%s828_s2] ss:$0 sm:$0xff]  ;;  %v596_v36 = vld [vmem:[#allocation8 + $0x8] sm:$0xff]   ;;  %v597_v37 = vld [vmem:[#allocation8] sm:$0xff]  }
  0x3d   :  { %v595_v35 = vld [vmem:[#allocation8 + $0x10] sm:$0xff]  }
  0x3e   :  { %v458_v38 = vld [vmem:[%s830_s4] ss:$0 sm:$0xff]  ;;  %s678_s4 = scalar_lea.vmem %s436_s27, 256 }
  0x3f   :  { %508 = vmatpush3.bf16.msra.mxu0 %v576_v3  ;;  %528 = vmatpush3.bf16.msra.mxu1 %v584_v8  ;;  %v467_v48 = vld [vmem:[%s832_s6] ss:$0 sm:$0xff]  ;;  %p679_p6 = scmp.ne.s32.totalorder %s436_s27, %s678_s4  ;;  %p684_p8 = scmp.lt.s32.totalorder %s678_s4, %s678_s4 }
  0x40   :  { %509 = vmatprep.subr.bf16.mxu0 %v714_v0  ;;  %529 = vmatprep.subr.bf16.mxu1 %v714_v0 }
  0x41   :  { %p685_p9 = por %p684_p8, %p683_p7 }
  0x43   :  { %510 = vmatpush3.bf16.msra.mxu0 %v577_v5  ;;  %530 = vmatpush3.bf16.msra.mxu1 %v585_v10  ;;  %p686_p10 = pnand %p685_p9, %p679_p6 }
  0x44   :  { %511 = vmatprep.subr.bf16.mxu0 %v714_v0  ;;  %531 = vmatprep.subr.bf16.mxu1 %v714_v0 }
  0x47   :  { %512 = vmatpush3.bf16.msra.mxu0 %v578_v7  ;;  %532 = vmatpush3.bf16.msra.mxu1 %v586_v12 }
  0x48   :  { %513 = vmatprep.subr.bf16.mxu0 %v714_v0  ;;  %533 = vmatprep.subr.bf16.mxu1 %v714_v0 }
  0x4b   :  { %514 = vmatpush3.bf16.msra.mxu0 %v579_v9  ;;  %534 = vmatpush3.bf16.msra.mxu1 %v587_v17 }
  0x4c   :  { %515 = vmatprep.subr.bf16.mxu0 %v714_v0  ;;  %535 = vmatprep.subr.bf16.mxu1 %v714_v0 }
  0x4f   :  { %516 = vmatpush3.bf16.msra.mxu0 %v580_v11  ;;  %536 = vmatpush3.bf16.msra.mxu1 %v588_v18 }
  0x50   :  { %517 = vmatprep.subr.bf16.mxu0 %v714_v0  ;;  %537 = vmatprep.subr.bf16.mxu1 %v714_v0 }
  0x53   :  { %518 = vmatpush3.bf16.msra.mxu0 %v581_v13  ;;  %538 = vmatpush3.bf16.msra.mxu1 %v589_v19 }
  0x54   :  { %543 = vmatprep.subr.bf16.mxu0 %v714_v0 }
  0x56   :  { %520 = vmatmul.mubr.bf16.vlgmr.msra.gmra.mxu0 %v85_v16 }
  0x57   :  { %559 = vmatprep.mubr.msk.bf16.mxu0 %vm715_vm0, %v714_v0  ;;  %544 = vmatpush3.bf16.msra.mxu0 %v590_v20 }
  0x58   :  { %545 = vmatprep.subr.bf16.mxu0 %v714_v0 }
  0x5b   :  { %546 = vmatpush3.bf16.msra.mxu0 %v591_v21 }
  0x5c   :  { %547 = vmatprep.subr.bf16.mxu0 %v714_v0 }
  0x5f   :  { %548 = vmatpush3.bf16.msra.mxu0 %v592_v22 }
  0x60   :  { %549 = vmatprep.subr.bf16.mxu0 %v714_v0 }
  0x63   :  { %550 = vmatpush3.bf16.msra.mxu0 %v593_v23 }
  0x64   :  { %551 = vmatprep.subr.bf16.mxu0 %v714_v0 }
  0x67   :  { %552 = vmatpush3.bf16.msra.mxu0 %v594_v24 }
  0x68   :  { %553 = vmatprep.subr.bf16.mxu0 %v714_v0 }
  0x6b   :  { %554 = vmatpush3.bf16.msra.mxu0 %v595_v35 }
  0x6c   :  { %555 = vmatprep.subr.bf16.mxu0 %v714_v0 }
  0x6f   :  { %556 = vmatpush3.bf16.msra.mxu0 %v596_v36 }
  0x70   :  { %557 = vmatprep.subr.bf16.mxu0 %v714_v0 }
  0x73   :  { %558 = vmatpush3.bf16.msra.mxu0 %v597_v37 }
 0x116   :  { %v191_v26 = vpop.f32.mrf.mxu0 }
 0x117   :  { %v192_v28 = vadd.f32 %v449_v25, %v191_v26 }
 0x118   :  { %v521_v27 = vpop.f32.mrf.mxu0 }
 0x119   :  { %v198_v32 = vmax.f32 %v192_v28, 0.0 }
 0x11a   :  { %v194_v29 = vpop.f32.mrf.mxu0 }
 0x11b   :  { %v195_v30 = vadd.f32 %v449_v25, %v194_v29 }
 0x11c   :  { %v522_v31 = vpop.f32.mrf.mxu0 }
 0x11d   :  { %v199_v33 = vmax.f32 %v195_v30, 0.0 }
 0x11f   :  { %v200_v34 = vpack.c.bf16 %v199_v33, %v198_v32 }
 0x121   :  { %540 = vmatmul.mubr.bf16.vlgmr.msra.gmra.mxu1 %v200_v34 }
 0x1e1   :  { %v306_v39 = vpop.f32.mrf.mxu1 }
 0x1e2   :  { %v307_v41 = vadd.f32 %v458_v38, %v306_v39 }
 0x1e3   :  { %v541_v40 = vpop.f32.mrf.mxu1 }
 0x1e4   :  { %v313_v45 = vmax.f32 %v307_v41, 0.0 }
 0x1e5   :  { %v309_v42 = vpop.f32.mrf.mxu1 }
 0x1e6   :  { %v310_v43 = vadd.f32 %v458_v38, %v309_v42 }
 0x1e7   :  { %v542_v44 = vpop.f32.mrf.mxu1 }
 0x1e8   :  { %v314_v46 = vmax.f32 %v310_v43, 0.0 }
 0x1ea   :  { %v315_v47 = vpack.c.bf16 %v314_v46, %v313_v45 }
 0x1ec   :  { %560 = vmatmul.mubr.bf16.vlgmr.msra.gmra.mxu0 %v315_v47 }
 0x2ac   :  { %v421_v49 = vpop.f32.mrf.mxu0 }
 0x2ad   :  { %v422_v50 = vadd.f32 %v467_v48, %v421_v49 }
 0x2ae   :  { %v561_v51 = vpop.f32.mrf.mxu0 }
 0x2af   :  { %428 = vst [vmem:[#allocation10] sm:$0xff] %v422_v50 }
 0x2b0   :  { %v424_v52 = vpop.f32.mrf.mxu0 }
 0x2b1   :  { %v425_v53 = vadd.f32 %v467_v48, %v424_v52 }
 0x2b2   :  { %v562_v54 = vpop.f32.mrf.mxu0 }
 0x2b3   :  { %429 = vst [vmem:[#allocation10 + $0x8] sm:$0xff] %v425_v53 }
 0x2b4   :  { %689 = shalt.err (!%p686_p10)
}
 0x2b5   :  { %441 = dma.vmem_to_hbm [thread:$0]  %s436_s27, 256, %s833_s7, [#allocation4], %s710_s11, %s710_s11, %s711_s12  }
 0x2b6   :  { %704 = dma.done.wait [#allocation4], 256  }
 0x2b7   :  { %705 = vsyncadd [#allocation4], 4294967040 }
 0x2b8   :  { %445 = vsyncpa [#allocation3], 1 }
 0x2b9   :  { %446 = vsyncpa [#allocation6], 1 }
 0x2ba   :  { %447 = vsyncpa [#allocation9], 1 }
 0x2bb   :  { %448 = vsyncpa [#allocation4], 1 }

</bundles_post_ra>
